<compile_context>
chip_gen: v7x
topology: tpu7x:2x2x1
jax: 0.10.0
libtpu: 0.0.40
codegen_flags: <defaults>
</compile_context>

<pallas_src>
import functools

import jax
import jax.numpy as jnp
from jax.experimental import pallas as pl
from jax.experimental.pallas import tpu as pltpu

_LANES = 128
_MAX_BLOCK_ROWS = 4096      # 4096*128*4B = 2 MiB f32 per block (safe v5e/v6e/v7x)
_SPLIT_ROWS = 1024          # >= this many rows -> use >=2 grid steps (megacore)
_FAST_PATH_ELEMS = 1 << 18  # below this, XLA's fused transpose beats a kernel call


def _permute22_kernel(x_ref, out_ref):
    """Swap elements 1 and 2 of every 4-lane group (== per-batch 2x2 transpose)."""
    x = x_ref[...]                                          # (block_rows, 128)
    # out[i] needs x[i+1] at lane%4==1 and x[i-1] at lane%4==2; lanes 0,3 copy.
    from_right = pltpu.roll(x, shift=_LANES - 1, axis=1)    # out[i] = x[i+1]
    from_left = pltpu.roll(x, shift=1, axis=1)              # out[i] = x[i-1]
    lane = jax.lax.broadcasted_iota(jnp.int32, x.shape, 1)
    mod4 = lane % 4
    out_ref[...] = jnp.where(mod4 == 1, from_right,
                             jnp.where(mod4 == 2, from_left, x))


def model_forward(x1, *, force_kernel=False, max_block_rows=_MAX_BLOCK_ROWS):
    """Equivalent of Model.forward: returns x1.permute(0, 2, 1).

    linear1/linear2 and the hardtanh chain in the reference are dead code and
    are intentionally not executed (they never touch the returned value).
    """
    B, C, L = x1.shape
    assert (C, L) == (2, 2), "module is specific to (B, 2, 2) inputs"
    dtype = x1.dtype
    n = B * 4

    # Small-input fast path: launch/pad overhead dominates the sub-us copy.
    if not force_kernel and n < _FAST_PATH_ELEMS:
        return jnp.swapaxes(x1, 1, 2)

    # Sublane granularity by dtype packing: 8 rows (f32), 16 (bf16), 32 (int8).
    itemsize = jnp.dtype(dtype).itemsize
    sub = 8 * max(1, 4 // itemsize)

    rows = pl.cdiv(n, _LANES)
    pad = rows * _LANES - n            # <= 127 elements; 0 when B % 32 == 0

    flat = x1.reshape(-1)              # row-major stream; free bitcast reshape
    if pad:
        flat = jnp.concatenate([flat, jnp.zeros((pad,), dtype=dtype)])
    x2d = flat.reshape(rows, _LANES)

    # Balanced tiling: nearly-full last block instead of padding to a slab.
    n_blocks = pl.cdiv(rows, max_block_rows)
    if n_blocks == 1 and rows >= _SPLIT_ROWS:
        n_blocks = 2                   # let megacore shard the parallel axis
    if n_blocks == 1:
        block_rows = rows              # block == full array dims: always legal
    else:
        block_rows = pl.cdiv(pl.cdiv(rows, n_blocks), sub) * sub
    grid = pl.cdiv(rows, block_rows)   # last block may be ragged (OOB-masked)

    out2d = pl.pallas_call(
        _permute22_kernel,
        out_shape=jax.ShapeDtypeStruct((rows, _LANES), dtype),
        grid=(grid,),
        in_specs=[pl.BlockSpec((block_rows, _LANES), lambda i: (i, 0))],
        out_specs=pl.BlockSpec((block_rows, _LANES), lambda i: (i, 0)),
        input_output_aliases={0: 0},
        compiler_params=pltpu.CompilerParams(
            dimension_semantics=("parallel",)),
    )(x2d)

    if pad:
        # Only needed when B % 32 != 0: trim the <=127 padded lanes.
        return out2d.reshape(-1)[:n].reshape(B, L, C)
    return out2d.reshape(B, L, C)      # free bitcast reshape


if __name__ == "__main__":
    key = jax.random.PRNGKey(0)
    k1, k2, k3 = jax.random.split(key, 3)

    # 1) Spec shape (x1 = torch.randn(1, 2, 2)) -> small-input fast path.
    x_small = jax.random.normal(k1, (1, 2, 2), dtype=jnp.float32)
    out_small = jax.block_until_ready(model_forward(x_small))
    ref_small = jnp.transpose(x_small, (0, 2, 1))
    assert out_small.shape == ref_small.shape
    assert out_small.dtype == ref_small.dtype
    assert bool(jnp.array_equal(out_small, ref_small))

    # 2) Kernel path, lane-dense single block (B % 32 == 0: no pad, no trim).
    fwd_kernel = jax.jit(functools.partial(model_forward, force_kernel=True))
    x_mid = jax.random.normal(k2, (1024, 2, 2), dtype=jnp.float32)
    out_mid = jax.block_until_ready(fwd_kernel(x_mid))
    assert bool(jnp.array_equal(out_mid, jnp.transpose(x_mid, (0, 2, 1))))

    # 3) Kernel path, multi-block grid with ragged last block + lane padding.
    fwd_multi = jax.jit(functools.partial(model_forward, force_kernel=True,
                                          max_block_rows=8))
    x_rag = jax.random.normal(k3, (1100, 2, 2), dtype=jnp.float32)
    out_rag = jax.block_until_ready(fwd_multi(x_rag))
    assert bool(jnp.array_equal(out_rag, jnp.transpose(x_rag, (0, 2, 1))))

    print("KERNEL_OK")
</pallas_src>

<mosaic_0001>
module attributes {stable_mosaic.version = 11 : i64} {
  func.func @_permute22_kernel(%arg0: i32, %arg1: memref<32x128xf32, #tpu.memory_space<vmem>>, %arg2: memref<32x128xf32, #tpu.memory_space<vmem>>) attributes {dimension_semantics = [#tpu.dimension_semantics<parallel>], iteration_bounds = array<i64: 1>, scalar_prefetch = 0 : i64, scratch_operands = 0 : i64, tpu.core_type = #tpu.core_type<tc>, window_params = [{transform_indices = @transform_0, window_bounds = array<i64: 32, 128>}, {transform_indices = @transform_1, window_bounds = array<i64: 32, 128>}]} {
    %c0 = arith.constant 0 : index
    %c0_0 = arith.constant 0 : index
    %0 = vector.load %arg1[%c0, %c0_0] : memref<32x128xf32, #tpu.memory_space<vmem>>, vector<32x128xf32>
    %c127_i32 = arith.constant 127 : i32
    %1 = tpu.dynamic_rotate %0 by %c127_i32 dim 1 : vector<32x128xf32>, i32 -> vector<32x128xf32>
    %c1_i32 = arith.constant 1 : i32
    %2 = tpu.dynamic_rotate %0 by %c1_i32 dim 1 : vector<32x128xf32>, i32 -> vector<32x128xf32>
    %3 = tpu.iota {dimensions = array<i32: 1>} : vector<32x128xi32>
    %c4_i32 = arith.constant 4 : i32
    %c0_i32 = arith.constant 0 : i32
    %4 = arith.cmpi eq, %c4_i32, %c0_i32 : i32
    %c1_i32_1 = arith.constant 1 : i32
    %5 = arith.select %4, %c1_i32_1, %c4_i32 : i32
    %6 = vector.broadcast %5 : i32 to vector<32x128xi32>
    %7 = arith.remsi %3, %6 : vector<32x128xi32>
    %c0_i32_2 = arith.constant 0 : i32
    %8 = vector.broadcast %c0_i32_2 : i32 to vector<32x128xi32>
    %9 = arith.cmpi ne, %7, %8 : vector<32x128xi32>
    %c0_i32_3 = arith.constant 0 : i32
    %10 = vector.broadcast %c0_i32_3 : i32 to vector<32x128xi32>
    %11 = arith.cmpi slt, %7, %10 : vector<32x128xi32>
    %c0_i32_4 = arith.constant 0 : i32
    %12 = arith.cmpi slt, %5, %c0_i32_4 : i32
    %13 = vector.broadcast %12 : i1 to vector<32x128xi1>
    %14 = vector.broadcast %13 : vector<32x128xi1> to vector<32x128xi1>
    %15 = arith.xori %11, %14 : vector<32x128xi1>
    %16 = arith.andi %15, %9 : vector<32x128xi1>
    %17 = vector.broadcast %5 : i32 to vector<32x128xi32>
    %18 = arith.addi %7, %17 : vector<32x128xi32>
    %19 = arith.select %16, %18, %7 : vector<32x128xi1>, vector<32x128xi32>
    %c1_i32_5 = arith.constant 1 : i32
    %20 = vector.broadcast %c1_i32_5 : i32 to vector<32x128xi32>
    %21 = arith.cmpi eq, %19, %20 : vector<32x128xi32>
    %c2_i32 = arith.constant 2 : i32
    %22 = vector.broadcast %c2_i32 : i32 to vector<32x128xi32>
    %23 = arith.cmpi eq, %19, %22 : vector<32x128xi32>
    %24 = arith.select %23, %2, %0 : vector<32x128xi1>, vector<32x128xf32>
    %25 = arith.select %21, %1, %24 : vector<32x128xi1>, vector<32x128xf32>
    %c0_6 = arith.constant 0 : index
    %c0_7 = arith.constant 0 : index
    %26 = vector.load %arg2[%c0_6, %c0_7] : memref<32x128xf32, #tpu.memory_space<vmem>>, vector<32x128xf32>
    tpu.vector_store %arg2[%c0_6, %c0_7], %25 {strides = array<i32>} : memref<32x128xf32, #tpu.memory_space<vmem>>, vector<32x128xf32>,
    return
  }
  func.func @transform_0(%arg0: i32) -> (i32, i32) {
    %c0_i32 = arith.constant 0 : i32
    %c0_i32_0 = arith.constant 0 : i32
    return %arg0, %c0_i32 : i32, i32
  }
  func.func @transform_1(%arg0: i32) -> (i32, i32) {
    %c0_i32 = arith.constant 0 : i32
    %c0_i32_0 = arith.constant 0 : i32
    return %arg0, %c0_i32 : i32, i32
  }
}

</mosaic_0001>

<bundles_post_ra>
// kernel: model_forward.1
= control target key start
LH: loop header
LB: loop body
LE: loop exit
PB: predicated region body
PF: predicated region fallthrough
CT: control target
= control target key end

     0   :  { %s62_s10 = smov 1   ;;  %s63_s15 = smov 127   ;;  %v28_v4 = vlaneseq  ;;  %s110_s0 = inlined_call_operand.vmem [shape: f32[32,128], index: 0, kind: input, shape index: {}, may-alias: {0,1}]   ;;  %s111_s1 = inlined_call_operand.vmem [shape: f32[32,128], index: 1, kind: output, shape index: {}, may-alias: {0,1}]  }
   0x1   :  { %v10_v0 = vld [vmem:[%s110_s0 + $0x10] sm:$0xff]  ;;  %v8_v1 = vld [vmem:[%s110_s0] sm:$0xff]  ;;  %v11_v2 = vld [vmem:[%s110_s0 + $0x18] sm:$0xff] }
   0x2   :  { %24 = vrot.lane.b32.xlu1 %v10_v0, %s62_s10  ;;  %20 = vrot.lane.b32.xlu0 %v8_v1, %s62_s10  ;;  %v9_v3 = vld [vmem:[%s110_s0 + $0x8] sm:$0xff]  ;;  %v29_v5 = vand.u32 127, %v28_v4 }
   0x4   :  { %v34_v8 = vand.u32 3, %v29_v5 }
   0x6   :  { %26 = vrot.lane.b32.xlu1 %v11_v2, %s62_s10  ;;  %22 = vrot.lane.b32.xlu0 %v9_v3, %s62_s10  ;;  %vm86_vm0 = vcmp.eq.s32.totalorder %v34_v8, 2  ;;  %vm42_vm1 = vcmp.eq.s32.totalorder %v34_v8, 1 }
   0xa   :  { %14 = vrot.lane.b32.xlu1 %v9_v3, %s63_s15  ;;  %12 = vrot.lane.b32.xlu0 %v8_v1, %s63_s15 }
   0xe   :  { %18 = vrot.lane.b32.xlu1 %v11_v2, %s63_s15  ;;  %16 = vrot.lane.b32.xlu0 %v10_v0, %s63_s15 }
  0x74   :  { %v25_v6 = vpop.permute.xlu1 %24  ;;  %v21_v7 = vpop.permute.xlu0 %20 }
  0x75   :  { %v44_v12 = vsel %vm86_vm0, %v21_v7, %v8_v1  ;;  %v46_v18 = vsel %vm86_vm0, %v25_v6, %v10_v0 }
  0x78   :  { %v27_v9 = vpop.permute.xlu1 %26  ;;  %v23_v10 = vpop.permute.xlu0 %22 }
  0x79   :  { %v45_v13 = vsel %vm86_vm0, %v23_v10, %v9_v3  ;;  %v47_v19 = vsel %vm86_vm0, %v27_v9, %v11_v2 }
  0x7c   :  { %v15_v14 = vpop.permute.xlu1 %14  ;;  %v13_v15 = vpop.permute.xlu0 %12 }
  0x7d   :  { %v49_v16 = vsel %vm42_vm1, %v15_v14, %v45_v13  ;;  %v48_v17 = vsel %vm42_vm1, %v13_v15, %v44_v12 }
  0x7e   :  { %53 = vst [vmem:[%s111_s1 + $0x8] sm:$0xff] %v49_v16  ;;  %52 = vst [vmem:[%s111_s1] sm:$0xff] %v48_v17 }
  0x80   :  { %v19_v20 = vpop.permute.xlu1 %18  ;;  %v17_v21 = vpop.permute.xlu0 %16 }
  0x81   :  { %v51_v22 = vsel %vm42_vm1, %v19_v20, %v47_v19  ;;  %v50_v23 = vsel %vm42_vm1, %v17_v21, %v46_v18 }
  0x82   :  { %55 = vst [vmem:[%s111_s1 + $0x18] sm:$0xff] %v51_v22  ;;  %54 = vst [vmem:[%s111_s1 + $0x10] sm:$0xff] %v50_v23 }

</bundles_post_ra>
